<compile_context>
chip_gen: v7x
topology: tpu7x:2x2x1
jax: 0.10.0
libtpu: 0.0.40
codegen_flags: <defaults>
</compile_context>

<pallas_src>
import jax
import jax.numpy as jnp
from jax.experimental import pallas as pl
from jax.experimental.pallas import tpu as pltpu

LANE = 128


def _round_up(v, m):
    return (v + m - 1) // m * m


def _choose_tile_n(n, max_tile=1024):
    """Pick the batch tile.

    - tiny batches: a single tile rounded up to 16 rows (bf16 sublane pack),
      no wasted MXU rows beyond that,
    - larger batches: aim for >= 2 grid steps (both v7x TensorCores busy),
      tiles capped at `max_tile` rows (v5e 16 MiB scoped-VMEM safe).
    """
    n16 = _round_up(max(n, 1), 16)
    if n16 <= 256:
        return n16
    return min(max_tile, _round_up(pl.cdiv(n16, 2), 16))


def _fused_mlp_kernel(x_ref, wb_ref, bb_ref, w1_ref, b1_ref, wo_ref, bo_ref,
                      o_ref):
    # base_model (synthetic Linear) + ReLU — bf16 operands, f32 accumulation.
    x = x_ref[...]
    h0 = jnp.dot(x, wb_ref[...], preferred_element_type=jnp.float32)
    h0 = jnp.maximum(h0 + bb_ref[...], 0.0)            # F.relu(base_model(x))
    # linear1 + ReLU
    h1 = jnp.dot(h0.astype(jnp.bfloat16), w1_ref[...],
                 preferred_element_type=jnp.float32)
    h1 = jnp.maximum(h1 + b1_ref[...], 0.0)            # F.relu(linear1(x))
    # output layer (no activation), lane-dense padded class dim
    out = jnp.dot(h1.astype(jnp.bfloat16), wo_ref[...],
                  preferred_element_type=jnp.float32)
    o_ref[...] = (out + bo_ref[...]).astype(o_ref.dtype)


def model_forward(x, params, *, max_tile_n=1024):
    """x: (N, in_features) float32.  params: dict of torch-layout weights."""
    n, in_features = x.shape

    # torch (out, in) weights -> (in, out) bf16; biases -> (1, out) f32.
    wb = params["base_w"].T.astype(jnp.bfloat16)
    bb = params["base_b"][None, :].astype(jnp.float32)
    w1 = params["lin1_w"].T.astype(jnp.bfloat16)
    b1 = params["lin1_b"][None, :].astype(jnp.float32)
    wo = params["out_w"].T.astype(jnp.bfloat16)
    bo = params["out_b"][None, :].astype(jnp.float32)

    num_classes = wo.shape[1]
    base_out = wb.shape[1]
    hidden = w1.shape[1]

    # Pad class dim to a lane-dense multiple of 128 (zero cols sliced off later).
    nc_pad = _round_up(num_classes, LANE)
    if nc_pad != num_classes:
        wo = jnp.pad(wo, ((0, 0), (0, nc_pad - num_classes)))
        bo = jnp.pad(bo, ((0, 0), (0, nc_pad - num_classes)))

    # Adaptive batch tiling (see _choose_tile_n); extra rows sliced off later.
    tile_n = _choose_tile_n(n, max_tile_n)
    n_pad = _round_up(n, tile_n)
    x_bf16 = x.astype(jnp.bfloat16)
    if n_pad != n:
        x_bf16 = jnp.pad(x_bf16, ((0, n_pad - n), (0, 0)))

    # Weights/biases: constant block index => DMA'd once, VMEM-resident.
    resident = lambda arr: pl.BlockSpec(arr.shape, lambda i: (0, 0))

    flops = 2 * n_pad * (in_features * base_out + base_out * hidden
                         + hidden * nc_pad)
    bytes_accessed = (x_bf16.size * 2
                      + (wb.size + w1.size + wo.size) * 2
                      + (bb.size + b1.size + bo.size) * 4
                      + n_pad * nc_pad * 4)

    out = pl.pallas_call(
        _fused_mlp_kernel,
        out_shape=jax.ShapeDtypeStruct((n_pad, nc_pad), jnp.float32),
        grid=(n_pad // tile_n,),
        in_specs=[pl.BlockSpec((tile_n, in_features), lambda i: (i, 0)),
                  resident(wb), resident(bb),
                  resident(w1), resident(b1),
                  resident(wo), resident(bo)],
        out_specs=pl.BlockSpec((tile_n, nc_pad), lambda i: (i, 0)),
        compiler_params=pltpu.CompilerParams(
            dimension_semantics=("parallel",)),
        cost_estimate=pl.CostEstimate(flops=flops, transcendentals=0,
                                      bytes_accessed=bytes_accessed),
    )(x_bf16, wb, bb, w1, b1, wo, bo)

    return out[:n, :num_classes]


def init_params(key, in_features, base_out_features, num_classes):
    """Deterministic PyTorch-style (uniform +-1/sqrt(fan_in)) init."""
    ks = jax.random.split(key, 6)

    def linear_init(kw, kb, fan_in, fan_out):
        bound = 1.0 / jnp.sqrt(float(fan_in))
        w = jax.random.uniform(kw, (fan_out, fan_in), jnp.float32, -bound, bound)
        b = jax.random.uniform(kb, (fan_out,), jnp.float32, -bound, bound)
        return w, b

    base_w, base_b = linear_init(ks[0], ks[1], in_features, base_out_features)
    lin1_w, lin1_b = linear_init(ks[2], ks[3], base_out_features, 512)
    out_w, out_b = linear_init(ks[4], ks[5], 512, num_classes)
    return {
        "base_w": base_w, "base_b": base_b,
        "lin1_w": lin1_w, "lin1_b": lin1_b,
        "out_w": out_w, "out_b": out_b,
    }


def _reference(x, p):
    """Reference mimicking the kernel's bf16 operand rounding (f32 accum)."""
    f = lambda a: a.astype(jnp.bfloat16).astype(jnp.float32)
    h0 = jnp.maximum(f(x) @ f(p["base_w"]).T + p["base_b"], 0.0)
    h1 = jnp.maximum(f(h0) @ f(p["lin1_w"]).T + p["lin1_b"], 0.0)
    return f(h1) @ f(p["out_w"]).T + p["out_b"]


if __name__ == "__main__":
    key = jax.random.PRNGKey(0)
    k_x, k_p = jax.random.split(key)

    batch = 8                   # padded only to 16 rows inside the wrapper
    in_features = 256           # flattened backbone input features
    base_out_features = 256     # base_model output dim
    num_classes = 120           # dog breeds (padded to 128 inside the wrapper)

    # TODO(synk): base_model (arbitrary CNN backbone) synthesized as a single
    # Linear feature extractor; the classifier head matches the torch module.
    x = jax.random.normal(k_x, (batch, in_features), jnp.float32)
    params = init_params(k_p, in_features, base_out_features, num_classes)

    out = model_forward(x, params)
    out = jax.block_until_ready(out)

    ref = _reference(x, params)
    assert out.shape == (batch, num_classes)
    assert jnp.allclose(out, ref, atol=1e-2, rtol=1e-2), "mismatch vs reference"
    print("KERNEL_OK")
</pallas_src>

<mosaic_0001>
module attributes {stable_mosaic.version = 11 : i64} {
  func.func @_fused_mlp_kernel(%arg0: i32, %arg1: memref<16x256xbf16, #tpu.memory_space<vmem>>, %arg2: memref<256x256xbf16, #tpu.memory_space<vmem>>, %arg3: memref<1x256xf32, #tpu.memory_space<vmem>>, %arg4: memref<256x512xbf16, #tpu.memory_space<vmem>>, %arg5: memref<1x512xf32, #tpu.memory_space<vmem>>, %arg6: memref<512x128xbf16, #tpu.memory_space<vmem>>, %arg7: memref<1x128xf32, #tpu.memory_space<vmem>>, %arg8: memref<16x128xf32, #tpu.memory_space<vmem>>) attributes {dimension_semantics = [#tpu.dimension_semantics<parallel>], iteration_bounds = array<i64: 1>, scalar_prefetch = 0 : i64, scratch_operands = 0 : i64, tpu.core_type = #tpu.core_type<tc>, window_params = [{transform_indices = @transform_0, window_bounds = array<i64: 16, 256>}, {pipeline_mode = #tpu.pipeline_mode<synchronous>, transform_indices = @transform_1, window_bounds = array<i64: 256, 256>}, {pipeline_mode = #tpu.pipeline_mode<synchronous>, transform_indices = @transform_2, window_bounds = array<i64: 1, 256>}, {pipeline_mode = #tpu.pipeline_mode<synchronous>, transform_indices = @transform_3, window_bounds = array<i64: 256, 512>}, {pipeline_mode = #tpu.pipeline_mode<synchronous>, transform_indices = @transform_4, window_bounds = array<i64: 1, 512>}, {pipeline_mode = #tpu.pipeline_mode<synchronous>, transform_indices = @transform_5, window_bounds = array<i64: 512, 128>}, {pipeline_mode = #tpu.pipeline_mode<synchronous>, transform_indices = @transform_6, window_bounds = array<i64: 1, 128>}, {transform_indices = @transform_7, window_bounds = array<i64: 16, 128>}]} {
    %c0 = arith.constant 0 : index
    %c0_0 = arith.constant 0 : index
    %0 = vector.load %arg1[%c0, %c0_0] : memref<16x256xbf16, #tpu.memory_space<vmem>>, vector<16x256xbf16>
    %c0_1 = arith.constant 0 : index
    %c0_2 = arith.constant 0 : index
    %1 = vector.load %arg2[%c0_1, %c0_2] : memref<256x256xbf16, #tpu.memory_space<vmem>>, vector<256x256xbf16>
    %cst = arith.constant dense<0.000000e+00> : vector<16x256xf32>
    %2 = tpu.matmul %0, %1, %cst {dimension_numbers = #tpu.dot_dimension_numbers<[1], [0], [0], [1], [0, 0, 1, 1], [], []>} : vector<16x256xbf16>, vector<256x256xbf16>, vector<16x256xf32> -> vector<16x256xf32>
    %c0_3 = arith.constant 0 : index
    %c0_4 = arith.constant 0 : index
    %3 = vector.load %arg3[%c0_3, %c0_4] : memref<1x256xf32, #tpu.memory_space<vmem>>, vector<1x256xf32>
    %4 = vector.broadcast %3 : vector<1x256xf32> to vector<16x256xf32>
    %5 = arith.addf %2, %4 : vector<16x256xf32>
    %cst_5 = arith.constant 0.000000e+00 : f32
    %6 = vector.broadcast %cst_5 : f32 to vector<16x256xf32>
    %7 = arith.maximumf %5, %6 : vector<16x256xf32>
    %8 = arith.truncf %7 : vector<16x256xf32> to vector<16x256xbf16>
    %c0_6 = arith.constant 0 : index
    %c0_7 = arith.constant 0 : index
    %9 = vector.load %arg4[%c0_6, %c0_7] : memref<256x512xbf16, #tpu.memory_space<vmem>>, vector<256x512xbf16>
    %cst_8 = arith.constant dense<0.000000e+00> : vector<16x512xf32>
    %10 = tpu.matmul %8, %9, %cst_8 {dimension_numbers = #tpu.dot_dimension_numbers<[1], [0], [0], [1], [0, 0, 1, 1], [], []>} : vector<16x256xbf16>, vector<256x512xbf16>, vector<16x512xf32> -> vector<16x512xf32>
    %c0_9 = arith.constant 0 : index
    %c0_10 = arith.constant 0 : index
    %11 = vector.load %arg5[%c0_9, %c0_10] : memref<1x512xf32, #tpu.memory_space<vmem>>, vector<1x512xf32>
    %12 = vector.broadcast %11 : vector<1x512xf32> to vector<16x512xf32>
    %13 = arith.addf %10, %12 : vector<16x512xf32>
    %cst_11 = arith.constant 0.000000e+00 : f32
    %14 = vector.broadcast %cst_11 : f32 to vector<16x512xf32>
    %15 = arith.maximumf %13, %14 : vector<16x512xf32>
    %16 = arith.truncf %15 : vector<16x512xf32> to vector<16x512xbf16>
    %c0_12 = arith.constant 0 : index
    %c0_13 = arith.constant 0 : index
    %17 = vector.load %arg6[%c0_12, %c0_13] : memref<512x128xbf16, #tpu.memory_space<vmem>>, vector<512x128xbf16>
    %cst_14 = arith.constant dense<0.000000e+00> : vector<16x128xf32>
    %18 = tpu.matmul %16, %17, %cst_14 {dimension_numbers = #tpu.dot_dimension_numbers<[1], [0], [0], [1], [0, 0, 1, 1], [], []>} : vector<16x512xbf16>, vector<512x128xbf16>, vector<16x128xf32> -> vector<16x128xf32>
    %c0_15 = arith.constant 0 : index
    %c0_16 = arith.constant 0 : index
    %19 = vector.load %arg7[%c0_15, %c0_16] : memref<1x128xf32, #tpu.memory_space<vmem>>, vector<1x128xf32>
    %20 = vector.broadcast %19 : vector<1x128xf32> to vector<16x128xf32>
    %21 = arith.addf %18, %20 : vector<16x128xf32>
    %c0_17 = arith.constant 0 : index
    %c0_18 = arith.constant 0 : index
    %22 = vector.load %arg8[%c0_17, %c0_18] : memref<16x128xf32, #tpu.memory_space<vmem>>, vector<16x128xf32>
    tpu.vector_store %arg8[%c0_17, %c0_18], %21 {strides = array<i32>} : memref<16x128xf32, #tpu.memory_space<vmem>>, vector<16x128xf32>,
    return
  }
  func.func @transform_0(%arg0: i32) -> (i32, i32) {
    %c0_i32 = arith.constant 0 : i32
    %c0_i32_0 = arith.constant 0 : i32
    return %arg0, %c0_i32 : i32, i32
  }
  func.func @transform_1(%arg0: i32) -> (i32, i32) {
    %c0_i32 = arith.constant 0 : i32
    %c0_i32_0 = arith.constant 0 : i32
    %c0_i32_1 = arith.constant 0 : i32
    return %c0_i32, %c0_i32_0 : i32, i32
  }
  func.func @transform_2(%arg0: i32) -> (i32, i32) {
    %c0_i32 = arith.constant 0 : i32
    %c0_i32_0 = arith.constant 0 : i32
    %c0_i32_1 = arith.constant 0 : i32
    return %c0_i32, %c0_i32_0 : i32, i32
  }
  func.func @transform_3(%arg0: i32) -> (i32, i32) {
    %c0_i32 = arith.constant 0 : i32
    %c0_i32_0 = arith.constant 0 : i32
    %c0_i32_1 = arith.constant 0 : i32
    return %c0_i32, %c0_i32_0 : i32, i32
  }
  func.func @transform_4(%arg0: i32) -> (i32, i32) {
    %c0_i32 = arith.constant 0 : i32
    %c0_i32_0 = arith.constant 0 : i32
    %c0_i32_1 = arith.constant 0 : i32
    return %c0_i32, %c0_i32_0 : i32, i32
  }
  func.func @transform_5(%arg0: i32) -> (i32, i32) {
    %c0_i32 = arith.constant 0 : i32
    %c0_i32_0 = arith.constant 0 : i32
    %c0_i32_1 = arith.constant 0 : i32
    return %c0_i32, %c0_i32_0 : i32, i32
  }
  func.func @transform_6(%arg0: i32) -> (i32, i32) {
    %c0_i32 = arith.constant 0 : i32
    %c0_i32_0 = arith.constant 0 : i32
    %c0_i32_1 = arith.constant 0 : i32
    return %c0_i32, %c0_i32_0 : i32, i32
  }
  func.func @transform_7(%arg0: i32) -> (i32, i32) {
    %c0_i32 = arith.constant 0 : i32
    %c0_i32_0 = arith.constant 0 : i32
    return %arg0, %c0_i32 : i32, i32
  }
}

</mosaic_0001>

<bundles_post_ra>
// kernel: tpu_custom_call.1
= control target key start
LH: loop header
LB: loop body
LE: loop exit
PB: predicated region body
PF: predicated region fallthrough
CT: control target
= control target key end

     0   :  { %12 = vsyncpa [#allocation3], 0  ;;  %s1843_s0 = inlined_call_operand.hbm [shape: bf16[16,256], index: 0, kind: input, shape index: {}]   ;;  %s1844_s1 = inlined_call_operand.hbm [shape: bf16[256,256], index: 1, kind: input, shape index: {}]   ;;  %s1845_s2 = inlined_call_operand.vmem [shape: f32[1,256], index: 2, kind: input, shape index: {}]   ;;  %s1846_s3 = inlined_call_operand.hbm [shape: bf16[256,512], index: 3, kind: input, shape index: {}]   ;;  %s1847_s4 = inlined_call_operand.vmem [shape: f32[1,512], index: 4, kind: input, shape index: {}]   ;;  %s1848_s5 = inlined_call_operand.hbm [shape: bf16[512,128], index: 5, kind: input, shape index: {}]   ;;  %s1849_s6 = inlined_call_operand.vmem [shape: f32[1,128], index: 6, kind: input, shape index: {}]   ;;  %s1850_s7 = inlined_call_operand.hbm [shape: f32[16,128], index: 7, kind: output, shape index: {}]  }
   0x1   :  { %13 = vsyncpa [#allocation6], 0 }
   0x2   :  { %14 = vsyncpa [#allocation9], 0 }
   0x3   :  { %15 = vsyncpa [#allocation4], 0  ;;  %s1701_s24 = smov [#allocation5]   ;;  %s1702_s26 = smov [#allocation2]  }
   0x4   :  { %s33_s25 = sshll.u32 %s1701_s24, 4  ;;  %s21_s27 = sshll.u32 %s1702_s26, 4  ;;  %s34_s25 = int_to_ptr.vmem [resolvable:$true] %s33_s25  ;;  %s1752_s27 = int_to_ptr.vmem [resolvable:$true] %s21_s27 }
   0x5   :  { %s1583_s30 = scalar_lea.hbm %s1844_s1, 4096 }
   0x6   :  { %p1584_p0 = scmp.ne.s32.totalorder %s1844_s1, %s1583_s30  ;;  %p1587_p1 = scmp.lt.u32.totalorder %s1583_s30, %s1844_s1 }
   0x8   :  { %p1589_p2 = pnand %p1587_p1, %p1584_p0 }
   0xa   :  { %1592 = shalt.err (!%p1589_p2)
}
   0xb   :  { %s1593_s12 = scalar_lea.vmem %s34_s25, 4096  ;;  %p1598_p4 = scmp.lt.s32.totalorder %s34_s25, %s34_s25 }
   0xc   :  { %p1594_p3 = scmp.ne.s32.totalorder %s34_s25, %s1593_s12  ;;  %p1599_p5 = scmp.lt.s32.totalorder %s1593_s12, %s1593_s12 }
   0xe   :  { %p1600_p6 = por %p1599_p5, %p1598_p4 }
  0x10   :  { %p1601_p7 = pnand %p1600_p6, %p1594_p3 }
  0x12   :  { %1604 = shalt.err (!%p1601_p7)
}
  0x13   :  { %s1703_s13 = smov 128   ;;  %s1704_s14 = smov 8  }
  0x14   :  { %39 = dma.hbm_to_vmem [thread:$0]  %s1844_s1, 4096, %s34_s25, [#allocation6], %s1703_s13, %s1703_s13, %s1704_s14  }
  0x15   :  { %s1605_s19 = scalar_lea.hbm %s1843_s0, 256 }
  0x16   :  { %p1606_p8 = scmp.ne.s32.totalorder %s1843_s0, %s1605_s19  ;;  %p1609_p9 = scmp.lt.u32.totalorder %s1605_s19, %s1843_s0 }
  0x18   :  { %p1611_p10 = pnand %p1609_p9, %p1606_p8 }
  0x1a   :  { %1614 = shalt.err (!%p1611_p10)
}
  0x1b   :  { %s1615_s24 = scalar_lea.vmem %s1752_s27, 256  ;;  %p1620_p12 = scmp.lt.s32.totalorder %s1752_s27, %s1752_s27 }
  0x1c   :  { %p1616_p11 = scmp.ne.s32.totalorder %s1752_s27, %s1615_s24  ;;  %p1621_p13 = scmp.lt.s32.totalorder %s1615_s24, %s1615_s24 }
  0x1e   :  { %p1622_p0 = por %p1621_p13, %p1620_p12 }
  0x20   :  { %p1623_p1 = pnand %p1622_p0, %p1616_p11 }
  0x22   :  { %1626 = shalt.err (!%p1623_p1)
}
  0x23   :  { %27 = dma.hbm_to_vmem [thread:$0]  %s1843_s0, 256, %s1752_s27, [#allocation3], %s1703_s13, %s1703_s13, %s1704_s14  }
  0x24   :  { %s1705_s26 = smov [#allocation7]   ;;  %s1627_s8 = scalar_lea.hbm %s1846_s3, 8192 }
  0x25   :  { %s47_s28 = sshll.u32 %s1705_s26, 4  ;;  %p1628_p2 = scmp.ne.s32.totalorder %s1846_s3, %s1627_s8  ;;  %s48_s28 = int_to_ptr.vmem [resolvable:$true] %s47_s28 }
  0x26   :  { %p1631_p3 = scmp.lt.u32.totalorder %s1627_s8, %s1846_s3 }
  0x28   :  { %p1633_p4 = pnand %p1631_p3, %p1628_p2 }
  0x2a   :  { %1636 = shalt.err (!%p1633_p4)
}
  0x2b   :  { %s1637_s15 = scalar_lea.vmem %s48_s28, 8192  ;;  %p1642_p6 = scmp.lt.s32.totalorder %s48_s28, %s48_s28 }
  0x2c   :  { %p1638_p5 = scmp.ne.s32.totalorder %s48_s28, %s1637_s15  ;;  %p1643_p7 = scmp.lt.s32.totalorder %s1637_s15, %s1637_s15 }
  0x2e   :  { %p1644_p8 = por %p1643_p7, %p1642_p6 }
  0x30   :  { %p1645_p9 = pnand %p1644_p8, %p1638_p5 }
  0x32   :  { %1648 = shalt.err (!%p1645_p9)
}
  0x33   :  { %s1706_s0 = smov 256   ;;  %s1707_s27 = smov 16  }
  0x34   :  { %53 = dma.hbm_to_vmem [thread:$0]  %s1846_s3, 8192, %s48_s28, [#allocation6], %s1706_s0, %s1706_s0, %s1707_s27  }
  0x35   :  { %s1708_s18 = smov [#allocation8]   ;;  %s1649_s22 = scalar_lea.hbm %s1848_s5, 4096 }
  0x36   :  { %s61_s19 = sshll.u32 %s1708_s18, 4  ;;  %p1650_p10 = scmp.ne.s32.totalorder %s1848_s5, %s1649_s22  ;;  %s62_s19 = int_to_ptr.vmem [resolvable:$true] %s61_s19 }
  0x37   :  { %p1653_p11 = scmp.lt.u32.totalorder %s1649_s22, %s1848_s5 }
  0x39   :  { %p1655_p12 = pnand %p1653_p11, %p1650_p10 }
  0x3b   :  { %1658 = shalt.err (!%p1655_p12)
}
  0x3c   :  { %s1659_s26 = scalar_lea.vmem %s62_s19, 4096  ;;  %p1664_p0 = scmp.lt.s32.totalorder %s62_s19, %s62_s19 }
  0x3d   :  { %p1660_p13 = scmp.ne.s32.totalorder %s62_s19, %s1659_s26  ;;  %p1665_p1 = scmp.lt.s32.totalorder %s1659_s26, %s1659_s26 }
  0x3f   :  { %p1666_p2 = por %p1665_p1, %p1664_p0 }
  0x41   :  { %p1667_p3 = pnand %p1666_p2, %p1660_p13 }
  0x43   :  { %1670 = shalt.err (!%p1667_p3)
}
  0x44   :  { %s1709_s3 = smov 64   ;;  %s1710_s28 = smov 4  }
  0x45   :  { %67 = dma.hbm_to_vmem [thread:$0]  %s1848_s5, 4096, %s62_s19, [#allocation9], %s1709_s3, %s1709_s3, %s1710_s28  }
  0x46   :  { %1693 = dma.done.wait [#allocation3], 256  }
  0x47   :  { %1694 = vsyncadd [#allocation3], 4294967040 }
  0x48   :  { %1695 = dma.done.wait [#allocation6], 12288  }
  0x49   :  { %1696 = vsyncadd [#allocation6], 4294955008 }
  0x4a   :  { %1697 = dma.done.wait [#allocation9], 4096  }
  0x4b   :  { %1698 = vsyncadd [#allocation9], 4294963200  ;;  %v1404_v0 = vld [vmem:[#allocation5 + $0x4] ss:$8 sps:$4 sm:$0xff]   ;;  %v1406_v1 = vld [vmem:[#allocation5] ss:$8 sps:$4 sm:$0xff]  }
  0x4c   :  { %299 = vmatprep.subr.bf16.mxu0 %v1404_v0  ;;  %v1407_v2 = vld [vmem:[#allocation5 + $0x14] ss:$8 sps:$4 sm:$0xff]   ;;  %v1409_v3 = vld [vmem:[#allocation5 + $0x10] ss:$8 sps:$4 sm:$0xff]   ;;  %v1410_v4 = vld [vmem:[#allocation5 + $0x24] ss:$8 sps:$4 sm:$0xff]  }
  0x4d   :  { %300 = vmatpush1.bf16.msra.mxu0 %v1406_v1  ;;  %v1412_v5 = vld [vmem:[#allocation5 + $0x20] ss:$8 sps:$4 sm:$0xff]   ;;  %v1413_v6 = vld [vmem:[#allocation5 + $0x34] ss:$8 sps:$4 sm:$0xff]   ;;  %v1415_v7 = vld [vmem:[#allocation5 + $0x30] ss:$8 sps:$4 sm:$0xff]  }
  0x4e   :  { %301 = vmatprep.subr.bf16.mxu0 %v1407_v2  ;;  %v1416_v8 = vld [vmem:[#allocation5 + $0x44] ss:$8 sps:$4 sm:$0xff]   ;;  %v1418_v9 = vld [vmem:[#allocation5 + $0x40] ss:$8 sps:$4 sm:$0xff]   ;;  %v1419_v10 = vld [vmem:[#allocation5 + $0x54] ss:$8 sps:$4 sm:$0xff]  }
  0x4f   :  { %v1421_v11 = vld [vmem:[#allocation5 + $0x50] ss:$8 sps:$4 sm:$0xff]   ;;  %v1422_v12 = vld [vmem:[#allocation5 + $0x64] ss:$8 sps:$4 sm:$0xff]   ;;  %v1424_v13 = vld [vmem:[#allocation5 + $0x60] ss:$8 sps:$4 sm:$0xff]  }
  0x50   :  { %v1454_v14 = vld [vmem:[#allocation2 + $0x4] ss:$8 sps:$4 sm:$0xff]   ;;  %v1460_v17 = vld [vmem:[#allocation7] ss:$16 sps:$4 sm:$0xff]   ;;  %v1428_v20 = vld [vmem:[#allocation5 + $0x84] ss:$8 sps:$4 sm:$0xff]  }
  0x51   :  { %302 = vmatpush1.bf16.msra.mxu0 %v1409_v3  ;;  %v1455_v15 = vld [vmem:[#allocation7 + $0x4] ss:$16 sps:$4 sm:$0xff]   ;;  %331 = vmatprep.mubr.bf16.mxu0 %v1454_v14  ;;  %v1427_v19 = vld [vmem:[#allocation5 + $0x70] ss:$8 sps:$4 sm:$0xff]   ;;  %v1430_v23 = vld [vmem:[#allocation5 + $0x80] ss:$8 sps:$4 sm:$0xff]  }
  0x52   :  { %303 = vmatprep.subr.bf16.mxu0 %v1410_v4  ;;  %v1425_v16 = vld [vmem:[#allocation5 + $0x74] ss:$8 sps:$4 sm:$0xff]   ;;  %754 = vmatprep.subr.bf16.mxu1 %v1455_v15  ;;  %v1466_v21 = vld [vmem:[#allocation7 + $0x20] ss:$16 sps:$4 sm:$0xff]   ;;  %v1434_v28 = vld [vmem:[#allocation5 + $0xa4] ss:$8 sps:$4 sm:$0xff]  }
  0x53   :  { %v1461_v18 = vld [vmem:[#allocation7 + $0x24] ss:$16 sps:$4 sm:$0xff]   ;;  %755 = vmatpush1.bf16.msra.mxu1 %v1460_v17  ;;  %v1472_v24 = vld [vmem:[#allocation7 + $0x40] ss:$16 sps:$4 sm:$0xff]   ;;  %v1459_v52 = vld [vmem:[#allocation7 + $0xc] ss:$16 sps:$4 sm:$0xff]  }
  0x54   :  { %756 = vmatprep.subr.bf16.mxu1 %v1461_v18  ;;  %v1467_v22 = vld [vmem:[#allocation7 + $0x44] ss:$16 sps:$4 sm:$0xff]   ;;  %v1433_v27 = vld [vmem:[#allocation5 + $0x90] ss:$8 sps:$4 sm:$0xff]   ;;  %v1436_v31 = vld [vmem:[#allocation5 + $0xa0] ss:$8 sps:$4 sm:$0xff]  }
  0x55   :  { %304 = vmatpush1.bf16.msra.mxu0 %v1412_v5  ;;  %v1431_v25 = vld [vmem:[#allocation5 + $0x94] ss:$8 sps:$4 sm:$0xff]   ;;  %v1478_v29 = vld [vmem:[#allocation7 + $0x60] ss:$16 sps:$4 sm:$0xff]   ;;  %v1440_v36 = vld [vmem:[#allocation5 + $0xc4] ss:$8 sps:$4 sm:$0xff]  }
  0x56   :  { %305 = vmatprep.subr.bf16.mxu0 %v1413_v6  ;;  %v1473_v26 = vld [vmem:[#allocation7 + $0x64] ss:$16 sps:$4 sm:$0xff]   ;;  %v1484_v32 = vld [vmem:[#allocation7 + $0x80] ss:$16 sps:$4 sm:$0xff]   ;;  %v1457_v56 = vld [vmem:[#allocation7 + $0x8] ss:$16 sps:$4 sm:$0xff]  }
  0x57   :  { %757 = vmatpush1.bf16.msra.mxu1 %v1466_v21  ;;  %v1479_v30 = vld [vmem:[#allocation7 + $0x84] ss:$16 sps:$4 sm:$0xff]   ;;  %v1439_v35 = vld [vmem:[#allocation5 + $0xb0] ss:$8 sps:$4 sm:$0xff]   ;;  %v1442_v39 = vld [vmem:[#allocation5 + $0xc0] ss:$8 sps:$4 sm:$0xff]  }
  0x58   :  { %758 = vmatprep.subr.bf16.mxu1 %v1467_v22  ;;  %v1437_v33 = vld [vmem:[#allocation5 + $0xb4] ss:$8 sps:$4 sm:$0xff]   ;;  %v1490_v37 = vld [vmem:[#allocation7 + $0xa0] ss:$16 sps:$4 sm:$0xff]   ;;  %v1446_v44 = vld [vmem:[#allocation5 + $0xe4] ss:$8 sps:$4 sm:$0xff]  }
  0x59   :  { %306 = vmatpush1.bf16.msra.mxu0 %v1415_v7  ;;  %v1485_v34 = vld [vmem:[#allocation7 + $0xa4] ss:$16 sps:$4 sm:$0xff]   ;;  %v1496_v40 = vld [vmem:[#allocation7 + $0xc0] ss:$16 sps:$4 sm:$0xff]   ;;  %v1465_v58 = vld [vmem:[#allocation7 + $0x2c] ss:$16 sps:$4 sm:$0xff]  }
  0x5a   :  { %307 = vmatprep.subr.bf16.mxu0 %v1416_v8  ;;  %v1491_v38 = vld [vmem:[#allocation7 + $0xc4] ss:$16 sps:$4 sm:$0xff]   ;;  %v1445_v43 = vld [vmem:[#allocation5 + $0xd0] ss:$8 sps:$4 sm:$0xff]   ;;  %v1448_v47 = vld [vmem:[#allocation5 + $0xe0] ss:$8 sps:$4 sm:$0xff]  }
  0x5b   :  { %759 = vmatpush1.bf16.msra.mxu1 %v1472_v24  ;;  %v1443_v41 = vld [vmem:[#allocation5 + $0xd4] ss:$8 sps:$4 sm:$0xff]   ;;  %v1502_v45 = vld [vmem:[#allocation7 + $0xe0] ss:$16 sps:$4 sm:$0xff]   ;;  %v1463_v60 = vld [vmem:[#allocation7 + $0x28] ss:$16 sps:$4 sm:$0xff]  }
  0x5c   :  { %760 = vmatprep.subr.bf16.mxu1 %v1473_v26  ;;  %v1497_v42 = vld [vmem:[#allocation7 + $0xe4] ss:$16 sps:$4 sm:$0xff]   ;;  %v1508_v48 = vld [vmem:[#allocation7 + $0x100] ss:$16 sps:$4 sm:$0xff]   ;;  %v1471_v62 = vld [vmem:[#allocation7 + $0x4c] ss:$16 sps:$4 sm:$0xff]  }
  0x5d   :  { %308 = vmatpush1.bf16.msra.mxu0 %v1418_v9  ;;  %v1503_v46 = vld [vmem:[#allocation7 + $0x104] ss:$16 sps:$4 sm:$0xff]   ;;  %v1451_v51 = vld [vmem:[#allocation5 + $0xf0] ss:$8 sps:$4 sm:$0xff]   ;;  %v1477_v2 = vld [vmem:[#allocation7 + $0x6c] ss:$16 sps:$4 sm:$0xff]  }
  0x5e   :  { %309 = vmatprep.subr.bf16.mxu0 %v1419_v10  ;;  %v1449_v49 = vld [vmem:[#allocation5 + $0xf4] ss:$8 sps:$4 sm:$0xff]   ;;  %v1514_v53 = vld [vmem:[#allocation7 + $0x120] ss:$16 sps:$4 sm:$0xff]   ;;  %v1469_v0 = vld [vmem:[#allocation7 + $0x48] ss:$16 sps:$4 sm:$0xff]  }
  0x5f   :  { %761 = vmatpush1.bf16.msra.mxu1 %v1478_v29  ;;  %v1509_v50 = vld [vmem:[#allocation7 + $0x124] ss:$16 sps:$4 sm:$0xff]   ;;  %v1452_v55 = vld [vmem:[#allocation2] ss:$8 sps:$4 sm:$0xff]   ;;  %v1483_v5 = vld [vmem:[#allocation7 + $0x8c] ss:$16 sps:$4 sm:$0xff]  }
  0x60   :  { %762 = vmatprep.subr.bf16.mxu1 %v1479_v30  ;;  %v1515_v54 = vld [vmem:[#allocation7 + $0x144] ss:$16 sps:$4 sm:$0xff]   ;;  %v1520_v57 = vld [vmem:[#allocation7 + $0x140] ss:$16 sps:$4 sm:$0xff]   ;;  %v1475_v4 = vld [vmem:[#allocation7 + $0x68] ss:$16 sps:$4 sm:$0xff]  }
  0x61   :  { %310 = vmatpush1.bf16.msra.mxu0 %v1421_v11  ;;  %v1521_v59 = vld [vmem:[#allocation7 + $0x164] ss:$16 sps:$4 sm:$0xff]   ;;  %v1526_v61 = vld [vmem:[#allocation7 + $0x160] ss:$16 sps:$4 sm:$0xff]   ;;  %v1481_v6 = vld [vmem:[#allocation7 + $0x88] ss:$16 sps:$4 sm:$0xff]  }
  0x62   :  { %311 = vmatprep.subr.bf16.mxu0 %v1422_v12  ;;  %v1527_v63 = vld [vmem:[#allocation7 + $0x184] ss:$16 sps:$4 sm:$0xff]   ;;  %v1532_v1 = vld [vmem:[#allocation7 + $0x180] ss:$16 sps:$4 sm:$0xff]   ;;  %v1489_v7 = vld [vmem:[#allocation7 + $0xac] ss:$16 sps:$4 sm:$0xff]  }
  0x63   :  { %763 = vmatpush1.bf16.msra.mxu1 %v1484_v32  ;;  %v1533_v3 = vld [vmem:[#allocation7 + $0x1a4] ss:$16 sps:$4 sm:$0xff]   ;;  %v1487_v8 = vld [vmem:[#allocation7 + $0xa8] ss:$16 sps:$4 sm:$0xff]   ;;  %v1495_v9 = vld [vmem:[#allocation7 + $0xcc] ss:$16 sps:$4 sm:$0xff]  }
  0x64   :  { %764 = vmatprep.subr.bf16.mxu1 %v1485_v34  ;;  %v1493_v10 = vld [vmem:[#allocation7 + $0xc8] ss:$16 sps:$4 sm:$0xff]   ;;  %v1501_v11 = vld [vmem:[#allocation7 + $0xec] ss:$16 sps:$4 sm:$0xff]   ;;  %v1539_v26 = vld [vmem:[#allocation7 + $0x1c4] ss:$16 sps:$4 sm:$0xff]  }
  0x65   :  { %312 = vmatpush1.bf16.msra.mxu0 %v1424_v13  ;;  %v1499_v12 = vld [vmem:[#allocation7 + $0xe8] ss:$16 sps:$4 sm:$0xff]   ;;  %v1507_v13 = vld [vmem:[#allocation7 + $0x10c] ss:$16 sps:$4 sm:$0xff]   ;;  %v1544_v29 = vld [vmem:[#allocation7 + $0x1c0] ss:$16 sps:$4 sm:$0xff]  }
  0x66   :  { %313 = vmatprep.subr.bf16.mxu0 %v1425_v16  ;;  %v1505_v14 = vld [vmem:[#allocation7 + $0x108] ss:$16 sps:$4 sm:$0xff]   ;;  %v1513_v15 = vld [vmem:[#allocation7 + $0x12c] ss:$16 sps:$4 sm:$0xff]   ;;  %v1545_v30 = vld [vmem:[#allocation7 + $0x1e4] ss:$16 sps:$4 sm:$0xff]  }
  0x67   :  { %765 = vmatpush1.bf16.msra.mxu1 %v1490_v37  ;;  %v1511_v16 = vld [vmem:[#allocation7 + $0x128] ss:$16 sps:$4 sm:$0xff]   ;;  %v1519_v17 = vld [vmem:[#allocation7 + $0x14c] ss:$16 sps:$4 sm:$0xff]   ;;  %v1551_v34 = vld [vmem:[#allocation8 + $0x40] sm:$0xff]   ;;  %s1711_s11 = smov [#allocation10]  }
  0x68   :  { %766 = vmatprep.subr.bf16.mxu1 %v1491_v38  ;;  %v1517_v18 = vld [vmem:[#allocation7 + $0x148] ss:$16 sps:$4 sm:$0xff]   ;;  %v1531_v21 = vld [vmem:[#allocation7 + $0x18c] ss:$16 sps:$4 sm:$0xff]   ;;  %v117_v38 = vld [vmem:[%s1845_s2] sm:$0x3] }
  0x69   :  { %314 = vmatpush1.bf16.msra.mxu0 %v1427_v19  ;;  %v1525_v19 = vld [vmem:[#allocation7 + $0x16c] ss:$16 sps:$4 sm:$0xff]   ;;  %v1529_v22 = vld [vmem:[#allocation7 + $0x188] ss:$16 sps:$4 sm:$0xff]   ;;  %s1204_s12 = sshll.u32 %s1711_s11, 4  ;;  %s1205_s12 = int_to_ptr.vmem [resolvable:$true] %s1204_s12 }
  0x6a   :  { %315 = vmatprep.subr.bf16.mxu0 %v1428_v20  ;;  %v1523_v20 = vld [vmem:[#allocation7 + $0x168] ss:$16 sps:$4 sm:$0xff]   ;;  %s1671_s15 = scalar_lea.vmem %s1205_s12, 256  ;;  %p1676_p5 = scmp.lt.s32.totalorder %s1205_s12, %s1205_s12 }
  0x6b   :  { %767 = vmatpush1.bf16.msra.mxu1 %v1496_v40  ;;  %v1535_v24 = vld [vmem:[#allocation7 + $0x1a8] ss:$16 sps:$4 sm:$0xff]   ;;  %p1672_p4 = scmp.ne.s32.totalorder %s1205_s12, %s1671_s15  ;;  %p1677_p6 = scmp.lt.s32.totalorder %s1671_s15, %s1671_s15 }
  0x6c   :  { %768 = vmatprep.subr.bf16.mxu1 %v1497_v42  ;;  %v1547_v32 = vld [vmem:[#allocation7 + $0x1e8] ss:$16 sps:$4 sm:$0xff]  }
  0x6d   :  { %316 = vmatpush1.bf16.msra.mxu0 %v1430_v23  ;;  %v1537_v23 = vld [vmem:[#allocation7 + $0x1ac] ss:$16 sps:$4 sm:$0xff]   ;;  %p1678_p7 = por %p1677_p6, %p1676_p5 }
  0x6e   :  { %317 = vmatprep.subr.bf16.mxu0 %v1431_v25  ;;  %v1538_v25 = vld [vmem:[#allocation7 + $0x1a0] ss:$16 sps:$4 sm:$0xff]  }
  0x6f   :  { %769 = vmatpush1.bf16.msra.mxu1 %v1502_v45  ;;  %p1679_p8 = pnand %p1678_p7, %p1672_p4 }
  0x70   :  { %770 = vmatprep.subr.bf16.mxu1 %v1503_v46 }
  0x71   :  { %318 = vmatpush1.bf16.msra.mxu0 %v1433_v27  ;;  %v1543_v27 = vld [vmem:[#allocation7 + $0x1cc] ss:$16 sps:$4 sm:$0xff]  }
  0x72   :  { %319 = vmatprep.subr.bf16.mxu0 %v1434_v28  ;;  %v1541_v28 = vld [vmem:[#allocation7 + $0x1c8] ss:$16 sps:$4 sm:$0xff]  }
  0x73   :  { %771 = vmatpush1.bf16.msra.mxu1 %v1508_v48 }
  0x74   :  { %772 = vmatprep.subr.bf16.mxu1 %v1509_v50 }
  0x75   :  { %320 = vmatpush1.bf16.msra.mxu0 %v1436_v31  ;;  %v1549_v31 = vld [vmem:[#allocation7 + $0x1ec] ss:$16 sps:$4 sm:$0xff]  }
  0x76   :  { %321 = vmatprep.subr.bf16.mxu0 %v1437_v33  ;;  %v1550_v33 = vld [vmem:[#allocation7 + $0x1e0] ss:$16 sps:$4 sm:$0xff]  }
  0x77   :  { %773 = vmatpush1.bf16.msra.mxu1 %v1514_v53 }
  0x78   :  { %774 = vmatprep.subr.bf16.mxu1 %v1515_v54 }
  0x79   :  { %322 = vmatpush1.bf16.msra.mxu0 %v1439_v35  ;;  %v119_v35 = vlaneseq }
  0x7a   :  { %323 = vmatprep.subr.bf16.mxu0 %v1440_v36 }
  0x7b   :  { %775 = vmatpush1.bf16.msra.mxu1 %v1520_v57  ;;  %v1813_v36 = vshrl.u32 %v119_v35, 7  ;;  %v1553_v57 = vld [vmem:[#allocation8 + $0x48] sm:$0xff]  }
  0x7c   :  { %776 = vmatprep.subr.bf16.mxu1 %v1521_v59  ;;  %v1555_v59 = vld [vmem:[#allocation8 + $0x50] sm:$0xff]  }
  0x7d   :  { %324 = vmatpush1.bf16.msra.mxu0 %v1442_v39  ;;  %v121_v37 = vsub.s32 0, %v1813_v36  ;;  %v125_v39 = vsub.s32 1, %v1813_v36 }
  0x7e   :  { %325 = vmatprep.subr.bf16.mxu0 %v1443_v41 }
  0x7f   :  { %777 = vmatpush1.bf16.msra.mxu1 %v1526_v61  ;;  %v122_v40 = vrot.slane %v117_v38, %v121_v37  ;;  %v126_v41 = vrot.slane %v117_v38, %v125_v39  ;;  %v1557_v61 = vld [vmem:[#allocation8 + $0x58] sm:$0xff]  }
  0x80   :  { %778 = vmatprep.subr.bf16.mxu1 %v1527_v63  ;;  %v1559_v63 = vld [vmem:[#allocation8 + $0x60] sm:$0xff]  }
  0x81   :  { %326 = vmatpush1.bf16.msra.mxu0 %v1445_v43 }
  0x82   :  { %327 = vmatprep.subr.bf16.mxu0 %v1446_v44 }
  0x83   :  { %779 = vmatpush1.bf16.msra.mxu1 %v1532_v1  ;;  %v1561_v1 = vld [vmem:[#allocation8 + $0x68] sm:$0xff]  }
  0x84   :  { %780 = vmatprep.subr.bf16.mxu1 %v1533_v3  ;;  %v1563_v3 = vld [vmem:[#allocation8 + $0x70] sm:$0xff]  }
  0x85   :  { %328 = vmatpush1.bf16.msra.mxu0 %v1448_v47 }
  0x86   :  { %329 = vmatprep.subr.bf16.mxu0 %v1449_v49 }
  0x87   :  { %781 = vmatpush1.bf16.msra.mxu1 %v1538_v25 }
  0x88   :  { %782 = vmatprep.subr.bf16.mxu1 %v1539_v26 }
  0x89   :  { %330 = vmatpush1.bf16.msra.mxu0 %v1451_v51 }
  0x8a   :  { %797 = vmatprep.subr.bf16.mxu0 %v1459_v52 }
  0x8b   :  { %783 = vmatpush1.bf16.msra.mxu1 %v1544_v29 }
  0x8c   :  { %332 = vmatmul.mubr.bf16.vlgmr.msra.gmra.mrb[0].mxu0 %v1452_v55  ;;  %784 = vmatprep.subr.bf16.mxu1 %v1545_v30 }
  0x8d   :  { %798 = vmatpush1.bf16.msra.mxu0 %v1457_v56  ;;  %v1552_v56 = vld [vmem:[#allocation8] sm:$0xff]  }
  0x8e   :  { %799 = vmatprep.subr.bf16.mxu0 %v1465_v58  ;;  %v1554_v58 = vld [vmem:[#allocation8 + $0x8] sm:$0xff]  }
  0x8f   :  { %785 = vmatpush1.bf16.msra.mxu1 %v1550_v33 }
  0x90   :  { %1349 = vmatprep.subr.bf16.mxu1 %v1551_v34 }
  0x91   :  { %800 = vmatpush1.bf16.msra.mxu0 %v1463_v60  ;;  %v1556_v60 = vld [vmem:[#allocation8 + $0x10] sm:$0xff]  }
  0x92   :  { %801 = vmatprep.subr.bf16.mxu0 %v1471_v62  ;;  %v1558_v62 = vld [vmem:[#allocation8 + $0x18] sm:$0xff]  }
  0x95   :  { %802 = vmatpush1.bf16.msra.mxu0 %v1469_v0  ;;  %v1560_v0 = vld [vmem:[#allocation8 + $0x20] sm:$0xff]  }
  0x96   :  { %803 = vmatprep.subr.bf16.mxu0 %v1477_v2  ;;  %v1562_v2 = vld [vmem:[#allocation8 + $0x28] sm:$0xff]  }
  0x99   :  { %804 = vmatpush1.bf16.msra.mxu0 %v1475_v4  ;;  %v1564_v4 = vld [vmem:[#allocation8 + $0x30] sm:$0xff]  }
  0x9a   :  { %805 = vmatprep.subr.bf16.mxu0 %v1483_v5  ;;  %v1565_v5 = vld [vmem:[#allocation8 + $0x78] sm:$0xff]  }
  0x9d   :  { %806 = vmatpush1.bf16.msra.mxu0 %v1481_v6  ;;  %v1566_v6 = vld [vmem:[#allocation8 + $0x38] sm:$0xff]  }
  0x9e   :  { %807 = vmatprep.subr.bf16.mxu0 %v1489_v7  ;;  %v1567_v7 = vld [vmem:[#allocation8 + $0xc0] sm:$0xff]  }
  0xa1   :  { %808 = vmatpush1.bf16.msra.mxu0 %v1487_v8  ;;  %v424_v8 = vsub.s32 2, %v1813_v36 }
  0xa2   :  { %809 = vmatprep.subr.bf16.mxu0 %v1495_v9  ;;  %v412_v9 = vld [vmem:[%s1847_s4] sm:$0xf] }
  0xa5   :  { %810 = vmatpush1.bf16.msra.mxu0 %v1493_v10  ;;  %v428_v10 = vsub.s32 3, %v1813_v36 }
  0xa6   :  { %811 = vmatprep.subr.bf16.mxu0 %v1501_v11  ;;  %v417_v11 = vrot.slane %v412_v9, %v121_v37 }
  0xa9   :  { %812 = vmatpush1.bf16.msra.mxu0 %v1499_v12  ;;  %v425_v12 = vrot.slane %v412_v9, %v424_v8 }
  0xaa   :  { %813 = vmatprep.subr.bf16.mxu0 %v1507_v13  ;;  %v421_v13 = vrot.slane %v412_v9, %v125_v39 }
  0xad   :  { %814 = vmatpush1.bf16.msra.mxu0 %v1505_v14  ;;  %v429_v14 = vrot.slane %v412_v9, %v428_v10 }
  0xae   :  { %815 = vmatprep.subr.bf16.mxu0 %v1513_v15 }
  0xb1   :  { %816 = vmatpush1.bf16.msra.mxu0 %v1511_v16 }
  0xb2   :  { %817 = vmatprep.subr.bf16.mxu0 %v1519_v17 }
  0xb5   :  { %818 = vmatpush1.bf16.msra.mxu0 %v1517_v18 }
  0xb6   :  { %819 = vmatprep.subr.bf16.mxu0 %v1525_v19 }
  0xb9   :  { %820 = vmatpush1.bf16.msra.mxu0 %v1523_v20 }
  0xba   :  { %821 = vmatprep.subr.bf16.mxu0 %v1531_v21 }
  0xbd   :  { %822 = vmatpush1.bf16.msra.mxu0 %v1529_v22 }
  0xbe   :  { %823 = vmatprep.subr.bf16.mxu0 %v1537_v23 }
  0xc1   :  { %824 = vmatpush1.bf16.msra.mxu0 %v1535_v24 }
  0xc2   :  { %825 = vmatprep.subr.bf16.mxu0 %v1543_v27 }
  0xc5   :  { %826 = vmatpush1.bf16.msra.mxu0 %v1541_v28 }
  0xc6   :  { %827 = vmatprep.subr.bf16.mxu0 %v1549_v31 }
  0xc9   :  { %828 = vmatpush1.bf16.msra.mxu0 %v1547_v32 }
 0x15f   :  { %v333_v42 = vpop.f32.mrb[0].mxu0 }
 0x160   :  { %v334_v43 = vadd.f32 %v333_v42, %v122_v40  ;;  %v335_v44 = vpop.f32.mrb[1].mxu0 }
 0x161   :  { %v336_v45 = vadd.f32 %v335_v44, %v126_v41  ;;  %v337_v46 = vpop.f32.mrb[2].mxu0  ;;  %v1569_v44 = vld [vmem:[#allocation8 + $0xc8] sm:$0xff]  }
 0x162   :  { %v338_v47 = vadd.f32 %v337_v46, %v122_v40  ;;  %v339_v48 = vpop.f32.mrb[3].mxu0  ;;  %v342_v50 = vmax.f32 %v334_v43, 0.0  ;;  %v1568_v43 = vld [vmem:[#allocation8 + $0x80] sm:$0xff]   ;;  %v1571_v46 = vld [vmem:[#allocation8 + $0xd0] sm:$0xff]  }
 0x163   :  { %v340_v49 = vadd.f32 %v339_v48, %v126_v41  ;;  %v343_v52 = vmax.f32 %v336_v45, 0.0  ;;  %v1570_v45 = vld [vmem:[#allocation8 + $0x88] sm:$0xff]   ;;  %v1573_v48 = vld [vmem:[#allocation8 + $0xd8] sm:$0xff]  }
 0x164   :  { %v344_v51 = vmax.f32 %v338_v47, 0.0  ;;  %v1572_v47 = vld [vmem:[#allocation8 + $0x90] sm:$0xff]  }
 0x165   :  { %v345_v53 = vmax.f32 %v340_v49, 0.0  ;;  %v1574_v49 = vld [vmem:[#allocation8 + $0x98] sm:$0xff]  }
 0x166   :  { %v346_v54 = vpack.c.bf16 %v344_v51, %v342_v50  ;;  %v1575_v50 = vld [vmem:[#allocation8 + $0xe0] sm:$0xff]  }
 0x167   :  { %v347_v55 = vpack.c.bf16 %v345_v53, %v343_v52  ;;  %v1576_v51 = vld [vmem:[#allocation8 + $0xa0] sm:$0xff]   ;;  %v1577_v52 = vld [vmem:[#allocation8 + $0xe8] sm:$0xff]  }
 0x168   :  { %v1578_v53 = vld [vmem:[#allocation8 + $0xa8] sm:$0xff]  }
 0x169   :  { %786 = vmatprep.mubr.bf16.mxu1 %v347_v55  ;;  %829 = vmatprep.mubr.bf16.mxu0 %v347_v55  ;;  %v1580_v55 = vld [vmem:[#allocation8 + $0xb0] sm:$0xff]  }
 0x16a   :  { %787 = vmatmul.mubr.bf16.vlgmr.msra.gmra.mrb[0].mxu1 %v346_v54  ;;  %830 = vmatmul.mubr.bf16.vlgmr.msra.gmra.mrb[4].mxu0 %v346_v54  ;;  %v1579_v54 = vld [vmem:[#allocation8 + $0xf0] sm:$0xff]  }
 0x16b   :  { %1350 = vmatpush3.bf16.msra.mxu1 %v1552_v56  ;;  %v1581_v56 = vld [vmem:[#allocation8 + $0xf8] sm:$0xff]  }
 0x16c   :  { %1351 = vmatprep.subr.bf16.mxu1 %v1553_v57  ;;  %v1582_v57 = vld [vmem:[#allocation8 + $0xb8] sm:$0xff]  }
 0x16f   :  { %1352 = vmatpush3.bf16.msra.mxu1 %v1554_v58 }
 0x170   :  { %1353 = vmatprep.subr.bf16.mxu1 %v1555_v59 }
 0x173   :  { %1354 = vmatpush3.bf16.msra.mxu1 %v1556_v60 }
 0x174   :  { %1355 = vmatprep.subr.bf16.mxu1 %v1557_v61 }
 0x177   :  { %1356 = vmatpush3.bf16.msra.mxu1 %v1558_v62 }
 0x178   :  { %1357 = vmatprep.subr.bf16.mxu1 %v1559_v63 }
 0x17b   :  { %1358 = vmatpush3.bf16.msra.mxu1 %v1560_v0  ;;  %v1316_v0 = vld [vmem:[%s1849_s6] ss:$0 sm:$0xff] }
 0x17c   :  { %1359 = vmatprep.subr.bf16.mxu1 %v1561_v1 }
 0x17f   :  { %1360 = vmatpush3.bf16.msra.mxu1 %v1562_v2 }
 0x180   :  { %1361 = vmatprep.subr.bf16.mxu1 %v1563_v3 }
 0x183   :  { %1362 = vmatpush3.bf16.msra.mxu1 %v1564_v4 }
 0x184   :  { %1363 = vmatprep.subr.bf16.mxu1 %v1565_v5 }
 0x187   :  { %1364 = vmatpush3.bf16.msra.mxu1 %v1566_v6 }
 0x188   :  { %1371 = vmatprep.subr.bf16.mxu1 %v1567_v7 }
 0x23d   :  { %v788_v15 = vpop.f32.mrb[0].mxu1  ;;  %v831_v16 = vpop.f32.mrb[4].mxu0 }
 0x23e   :  { %v789_v17 = vadd.f32 %v788_v15, %v417_v11  ;;  %v832_v18 = vadd.f32 %v831_v16, %v425_v12  ;;  %v790_v19 = vpop.f32.mrb[1].mxu1  ;;  %v833_v20 = vpop.f32.mrb[5].mxu0 }
 0x23f   :  { %v791_v21 = vadd.f32 %v790_v19, %v421_v13  ;;  %v834_v22 = vadd.f32 %v833_v20, %v429_v14  ;;  %v792_v23 = vpop.f32.mrb[2].mxu1  ;;  %v835_v24 = vpop.f32.mrb[6].mxu0 }
 0x240   :  { %v793_v25 = vadd.f32 %v792_v23, %v417_v11  ;;  %v836_v26 = vadd.f32 %v835_v24, %v425_v12  ;;  %v794_v27 = vpop.f32.mrb[3].mxu1  ;;  %v837_v28 = vpop.f32.mrb[7].mxu0  ;;  %v840_v31 = vmax.f32 %v789_v17, 0.0  ;;  %v842_v32 = vmax.f32 %v832_v18, 0.0 }
 0x241   :  { %v795_v29 = vadd.f32 %v794_v27, %v421_v13  ;;  %v838_v30 = vadd.f32 %v837_v28, %v429_v14  ;;  %v841_v35 = vmax.f32 %v791_v21, 0.0  ;;  %v843_v36 = vmax.f32 %v834_v22, 0.0 }
 0x242   :  { %v844_v33 = vmax.f32 %v793_v25, 0.0  ;;  %v846_v34 = vmax.f32 %v836_v26, 0.0 }
 0x243   :  { %v845_v37 = vmax.f32 %v795_v29, 0.0  ;;  %v847_v38 = vmax.f32 %v838_v30, 0.0 }
 0x244   :  { %v848_v39 = vpack.c.bf16 %v844_v33, %v840_v31  ;;  %v850_v40 = vpack.c.bf16 %v846_v34, %v842_v32 }
 0x245   :  { %v849_v41 = vpack.c.bf16 %v845_v37, %v841_v35  ;;  %v851_v42 = vpack.c.bf16 %v847_v38, %v843_v36 }
 0x247   :  { %1147 = vmatprep.mubr.bf16.mxu1 %v849_v41 }
 0x248   :  { %1148 = vmatmul.mubr.bf16.vlgmr.msra.gmra.mrb[4].mxu1 %v848_v39 }
 0x249   :  { %1372 = vmatpush3.bf16.msra.mxu1 %v1568_v43  ;;  %1188 = vmatprep.mubr.bf16.mxu1 %v851_v42 }
 0x24a   :  { %1373 = vmatprep.subr.bf16.mxu1 %v1569_v44 }
 0x24d   :  { %1374 = vmatpush3.bf16.msra.mxu1 %v1570_v45 }
 0x24e   :  { %1375 = vmatprep.subr.bf16.mxu1 %v1571_v46 }
 0x251   :  { %1376 = vmatpush3.bf16.msra.mxu1 %v1572_v47 }
 0x252   :  { %1377 = vmatprep.subr.bf16.mxu1 %v1573_v48 }
 0x255   :  { %1378 = vmatpush3.bf16.msra.mxu1 %v1574_v49 }
 0x256   :  { %1379 = vmatprep.subr.bf16.mxu1 %v1575_v50 }
 0x259   :  { %1380 = vmatpush3.bf16.msra.mxu1 %v1576_v51 }
 0x25a   :  { %1381 = vmatprep.subr.bf16.mxu1 %v1577_v52 }
 0x25d   :  { %1382 = vmatpush3.bf16.msra.mxu1 %v1578_v53 }
 0x25e   :  { %1383 = vmatprep.subr.bf16.mxu1 %v1579_v54 }
 0x261   :  { %1384 = vmatpush3.bf16.msra.mxu1 %v1580_v55 }
 0x262   :  { %1385 = vmatprep.subr.bf16.mxu1 %v1581_v56 }
 0x265   :  { %1386 = vmatpush3.bf16.msra.mxu1 %v1582_v57 }
 0x268   :  { %1189 = vmatmul.mubr.bf16.vlgmr.msra.gmra.mrb[8].mxu1 %v850_v40 }
 0x31b   :  { %v1365_v58 = vpop.f32.mrb[4].mxu1 }
 0x31c   :  { %v1366_v59 = vpop.f32.mrb[5].mxu1 }
 0x31d   :  { %v1367_v60 = vadd.f32 %v1366_v59, %v1365_v58  ;;  %v1368_v61 = vpop.f32.mrb[6].mxu1 }
 0x31e   :  { %v1369_v62 = vpop.f32.mrb[7].mxu1 }
 0x31f   :  { %v1370_v63 = vadd.f32 %v1369_v62, %v1368_v61  ;;  %v1150_v3 = vadd.f32 %v1367_v60, %v1316_v0 }
 0x321   :  { %v1153_v7 = vadd.f32 %v1370_v63, %v1316_v0 }
 0x33b   :  { %v1387_v1 = vpop.f32.mrb[8].mxu1 }
 0x33c   :  { %v1388_v2 = vpop.f32.mrb[9].mxu1 }
 0x33d   :  { %v1389_v4 = vadd.f32 %v1388_v2, %v1387_v1  ;;  %v1390_v5 = vpop.f32.mrb[10].mxu1 }
 0x33e   :  { %v1391_v6 = vpop.f32.mrb[11].mxu1 }
 0x33f   :  { %v1191_v8 = vadd.f32 %v1389_v4, %v1150_v3  ;;  %v1392_v9 = vadd.f32 %v1391_v6, %v1390_v5 }
 0x341   :  { %1197 = vst [vmem:[#allocation10] sm:$0xff] %v1191_v8  ;;  %v1194_v10 = vadd.f32 %v1392_v9, %v1153_v7 }
 0x343   :  { %1198 = vst [vmem:[#allocation10 + $0x8] sm:$0xff] %v1194_v10 }
 0x344   :  { %1682 = shalt.err (!%p1679_p8)
}
 0x345   :  { %s1683_s27 = scalar_lea.hbm %s1850_s7, 256 }
 0x346   :  { %p1684_p9 = scmp.ne.s32.totalorder %s1850_s7, %s1683_s27  ;;  %p1687_p10 = scmp.lt.u32.totalorder %s1683_s27, %s1850_s7 }
 0x348   :  { %p1689_p11 = pnand %p1687_p10, %p1684_p9 }
 0x34a   :  { %1692 = shalt.err (!%p1689_p11)
}
 0x34b   :  { %1210 = dma.vmem_to_hbm [thread:$0]  %s1205_s12, 256, %s1850_s7, [#allocation4], %s1703_s13, %s1703_s13, %s1704_s14  }
 0x34c   :  { %1699 = dma.done.wait [#allocation4], 256  }
 0x34d   :  { %1700 = vsyncadd [#allocation4], 4294967040 }
 0x34e   :  { %1214 = vsyncpa [#allocation3], 1 }
 0x34f   :  { %1215 = vsyncpa [#allocation6], 1 }
 0x350   :  { %1216 = vsyncpa [#allocation9], 1 }
 0x351   :  { %1217 = vsyncpa [#allocation4], 1 }

</bundles_post_ra>
